<compile_context>
chip_gen: v6e
topology: v6e:2x2x1
jax: 0.10.0
libtpu: 0.0.40
codegen_flags: <defaults>
</compile_context>

<pallas_src>
import functools

import jax
import jax.numpy as jnp
from jax import lax
from jax.experimental import pallas as pl
from jax.experimental.pallas import tpu as pltpu


def _blur_kernel(x_ref, o_ref, *, plane_h):
    """x_ref/o_ref: (B*plane_h, W) blocks holding B stacked image planes."""
    x = x_ref[...].astype(jnp.float32)
    bh, w = x.shape
    row = lax.broadcasted_iota(jnp.int32, (bh, w), 0) % plane_h   # row within plane
    col = lax.broadcasted_iota(jnp.int32, (bh, w), 1)

    # Horizontal pass: h[j] = x[j-1] + 2*x[j] + x[j+1], zero outside the image.
    # pltpu.roll is circular; the wrapped lanes are exactly the masked ones.
    left  = jnp.where(col == 0,     0.0, pltpu.roll(x, 1,     axis=1))   # x[:, j-1]
    right = jnp.where(col == w - 1, 0.0, pltpu.roll(x, w - 1, axis=1))   # x[:, j+1]
    hp = left + 2.0 * x + right

    # Vertical pass: v[i] = h[i-1] + 2*h[i] + h[i+1], zero outside the image.
    # Masks also kill rows pulled across plane boundaries inside the block.
    up   = jnp.where(row == 0,           0.0, pltpu.roll(hp, 1,      axis=0))  # hp[i-1]
    down = jnp.where(row == plane_h - 1, 0.0, pltpu.roll(hp, bh - 1, axis=0))  # hp[i+1]
    out = (up + 2.0 * hp + down) * (1.0 / 16.0)

    o_ref[...] = out.astype(o_ref.dtype)


def _choose_plane_batch(nc, h, w, itemsize):
    """Planes per grid step: largest divisor of nc whose (in+out, double
    buffered) block footprint stays <= ~16 MiB, keeping >=2 grid steps (v7x
    megacore) and an 8-aligned block row count (the (8,128) rule)."""
    budget = 16 * 1024 * 1024
    per_plane = 2 * 2 * h * w * itemsize          # in + out, double-buffered
    bmax = max(1, budget // per_plane)
    best = 1
    for b in range(1, nc + 1):
        if b > bmax:
            break
        if nc % b:
            continue
        if (b * h) % 8 != 0 and b != nc:
            continue                               # block 2nd-minor must be 8-aligned
        if nc // b >= 2 or nc == 1:
            best = b
    return best


def blur_forward(x):
    """Forward pass of Blur: depthwise 3x3 blur, padding=1, groups=C.

    x: (N, C, H, W) float32. Taps are the module's fixed normalized
    [1,2,1;2,4,2;1,2,1]/16 kernel (identical across channels by construction),
    so no weight tensor is taken.
    """
    N, C, H, W = x.shape
    nc = N * C
    b = _choose_plane_batch(nc, H, W, x.dtype.itemsize)
    # TODO(synk): for very large planes (a single (H, W) plane too big for
    # VMEM) tile H with a 1-row halo; not needed at these sizes.
    xf = x.reshape(nc * H, W)                      # free reshape; W stays on lanes

    out = pl.pallas_call(
        functools.partial(_blur_kernel, plane_h=H),
        out_shape=jax.ShapeDtypeStruct((nc * H, W), x.dtype),
        grid=(nc // b,),
        in_specs=[pl.BlockSpec((b * H, W), lambda i: (i, 0))],
        out_specs=pl.BlockSpec((b * H, W), lambda i: (i, 0)),
        compiler_params=pltpu.CompilerParams(
            dimension_semantics=("parallel",)),
    )(xf)
    return out.reshape(N, C, H, W)


def make_blur_weights(channel):
    """Deterministic parameter construction matching Blur.__init__ (used only
    by the reference check; the Pallas kernel hardcodes these taps)."""
    w = jnp.array([[1., 2., 1.], [2., 4., 2.], [1., 2., 1.]], dtype=jnp.float32)
    w = w / w.sum()                                # sums to 1
    w = w.reshape(1, 1, 3, 3)
    weight = jnp.tile(w, (channel, 1, 1, 1))       # (C, 1, 3, 3)
    weight_flip = jnp.flip(weight, axis=(2, 3))    # identical (symmetric kernel)
    return weight, weight_flip


def _reference(x, weight):
    # Independent check via lax depthwise conv (NCHW, OIHW).
    C = x.shape[1]
    return lax.conv_general_dilated(
        x, weight, window_strides=(1, 1), padding=((1, 1), (1, 1)),
        dimension_numbers=("NCHW", "OIHW", "NCHW"), feature_group_count=C)


if __name__ == "__main__":
    N, C, H, W = 2, 4, 16, 16
    key = jax.random.PRNGKey(0)
    x = jax.random.normal(key, (N, C, H, W), dtype=jnp.float32)

    y = jax.block_until_ready(blur_forward(x))

    weight, _ = make_blur_weights(C)
    y_ref = _reference(x, weight)
    assert y.shape == (N, C, H, W)
    assert jnp.max(jnp.abs(y - y_ref)) < 1e-5

    print("KERNEL_OK")
</pallas_src>

<mosaic_0001>
module attributes {stable_mosaic.version = 11 : i64} {
  func.func @_blur_kernel(%arg0: i32, %arg1: memref<64x16xf32, #tpu.memory_space<vmem>>, %arg2: memref<64x16xf32, #tpu.memory_space<vmem>>) attributes {dimension_semantics = [#tpu.dimension_semantics<parallel>], iteration_bounds = array<i64: 2>, scalar_prefetch = 0 : i64, scratch_operands = 0 : i64, tpu.core_type = #tpu.core_type<tc>, window_params = [{transform_indices = @transform_0, window_bounds = array<i64: 64, 16>}, {transform_indices = @transform_1, window_bounds = array<i64: 64, 16>}]} {
    %c0 = arith.constant 0 : index
    %c0_0 = arith.constant 0 : index
    %0 = vector.load %arg1[%c0, %c0_0] : memref<64x16xf32, #tpu.memory_space<vmem>>, vector<64x16xf32>
    %1 = tpu.iota {dimensions = array<i32: 0>} : vector<64x16xi32>
    %c16_i32 = arith.constant 16 : i32
    %c0_i32 = arith.constant 0 : i32
    %2 = arith.cmpi eq, %c16_i32, %c0_i32 : i32
    %c1_i32 = arith.constant 1 : i32
    %3 = arith.select %2, %c1_i32, %c16_i32 : i32
    %4 = vector.broadcast %3 : i32 to vector<64x16xi32>
    %5 = arith.remsi %1, %4 : vector<64x16xi32>
    %c0_i32_1 = arith.constant 0 : i32
    %6 = vector.broadcast %c0_i32_1 : i32 to vector<64x16xi32>
    %7 = arith.cmpi ne, %5, %6 : vector<64x16xi32>
    %c0_i32_2 = arith.constant 0 : i32
    %8 = vector.broadcast %c0_i32_2 : i32 to vector<64x16xi32>
    %9 = arith.cmpi slt, %5, %8 : vector<64x16xi32>
    %c0_i32_3 = arith.constant 0 : i32
    %10 = arith.cmpi slt, %3, %c0_i32_3 : i32
    %11 = vector.broadcast %10 : i1 to vector<64x16xi1>
    %12 = vector.broadcast %11 : vector<64x16xi1> to vector<64x16xi1>
    %13 = arith.xori %9, %12 : vector<64x16xi1>
    %14 = arith.andi %13, %7 : vector<64x16xi1>
    %15 = vector.broadcast %3 : i32 to vector<64x16xi32>
    %16 = arith.addi %5, %15 : vector<64x16xi32>
    %17 = arith.select %14, %16, %5 : vector<64x16xi1>, vector<64x16xi32>
    %18 = tpu.iota {dimensions = array<i32: 1>} : vector<64x16xi32>
    %c0_i32_4 = arith.constant 0 : i32
    %19 = vector.broadcast %c0_i32_4 : i32 to vector<64x16xi32>
    %20 = arith.cmpi eq, %18, %19 : vector<64x16xi32>
    %c1_i32_5 = arith.constant 1 : i32
    %21 = tpu.dynamic_rotate %0 by %c1_i32_5 dim 1 : vector<64x16xf32>, i32 -> vector<64x16xf32>
    %cst = arith.constant 0.000000e+00 : f32
    %22 = vector.broadcast %cst : f32 to vector<64x16xf32>
    %23 = arith.select %20, %22, %21 : vector<64x16xi1>, vector<64x16xf32>
    %c15_i32 = arith.constant 15 : i32
    %24 = vector.broadcast %c15_i32 : i32 to vector<64x16xi32>
    %25 = arith.cmpi eq, %18, %24 : vector<64x16xi32>
    %c15_i32_6 = arith.constant 15 : i32
    %26 = tpu.dynamic_rotate %0 by %c15_i32_6 dim 1 : vector<64x16xf32>, i32 -> vector<64x16xf32>
    %cst_7 = arith.constant 0.000000e+00 : f32
    %27 = vector.broadcast %cst_7 : f32 to vector<64x16xf32>
    %28 = arith.select %25, %27, %26 : vector<64x16xi1>, vector<64x16xf32>
    %cst_8 = arith.constant 2.000000e+00 : f32
    %29 = vector.broadcast %cst_8 : f32 to vector<64x16xf32>
    %30 = arith.mulf %29, %0 : vector<64x16xf32>
    %31 = arith.addf %23, %30 : vector<64x16xf32>
    %32 = arith.addf %31, %28 : vector<64x16xf32>
    %c0_i32_9 = arith.constant 0 : i32
    %33 = vector.broadcast %c0_i32_9 : i32 to vector<64x16xi32>
    %34 = arith.cmpi eq, %17, %33 : vector<64x16xi32>
    %c1_i32_10 = arith.constant 1 : i32
    %35 = tpu.dynamic_rotate %32 by %c1_i32_10 dim 0 : vector<64x16xf32>, i32 -> vector<64x16xf32>
    %cst_11 = arith.constant 0.000000e+00 : f32
    %36 = vector.broadcast %cst_11 : f32 to vector<64x16xf32>
    %37 = arith.select %34, %36, %35 : vector<64x16xi1>, vector<64x16xf32>
    %c15_i32_12 = arith.constant 15 : i32
    %38 = vector.broadcast %c15_i32_12 : i32 to vector<64x16xi32>
    %39 = arith.cmpi eq, %17, %38 : vector<64x16xi32>
    %c63_i32 = arith.constant 63 : i32
    %40 = tpu.dynamic_rotate %32 by %c63_i32 dim 0 : vector<64x16xf32>, i32 -> vector<64x16xf32>
    %cst_13 = arith.constant 0.000000e+00 : f32
    %41 = vector.broadcast %cst_13 : f32 to vector<64x16xf32>
    %42 = arith.select %39, %41, %40 : vector<64x16xi1>, vector<64x16xf32>
    %cst_14 = arith.constant 2.000000e+00 : f32
    %43 = vector.broadcast %cst_14 : f32 to vector<64x16xf32>
    %44 = arith.mulf %43, %32 : vector<64x16xf32>
    %45 = arith.addf %37, %44 : vector<64x16xf32>
    %46 = arith.addf %45, %42 : vector<64x16xf32>
    %cst_15 = arith.constant 6.250000e-02 : f32
    %47 = vector.broadcast %cst_15 : f32 to vector<64x16xf32>
    %48 = arith.mulf %46, %47 : vector<64x16xf32>
    %c0_16 = arith.constant 0 : index
    %c0_17 = arith.constant 0 : index
    %49 = vector.load %arg2[%c0_16, %c0_17] : memref<64x16xf32, #tpu.memory_space<vmem>>, vector<64x16xf32>
    tpu.vector_store %arg2[%c0_16, %c0_17], %48 {strides = array<i32>} : memref<64x16xf32, #tpu.memory_space<vmem>>, vector<64x16xf32>,
    return
  }
  func.func @transform_0(%arg0: i32) -> (i32, i32) {
    %c0_i32 = arith.constant 0 : i32
    %c0_i32_0 = arith.constant 0 : i32
    return %arg0, %c0_i32 : i32, i32
  }
  func.func @transform_1(%arg0: i32) -> (i32, i32) {
    %c0_i32 = arith.constant 0 : i32
    %c0_i32_0 = arith.constant 0 : i32
    return %arg0, %c0_i32 : i32, i32
  }
}

</mosaic_0001>

<bundles_post_ra>
// kernel: tpu_custom_call.1
= control target key start
LH: loop header
LB: loop body
LE: loop exit
PB: predicated region body
PF: predicated region fallthrough
CT: control target
= control target key end

     0   :  { %s588_s6 = smov 0   ;;  %s875_s0 = inlined_call_operand.vmem [shape: f32[128,16], index: 0, kind: input, shape index: {}]   ;;  %s876_s1 = inlined_call_operand.vmem [shape: f32[128,16], index: 1, kind: output, shape index: {}]  }
   0x1 LB: > { %s545_s7 = sadd.s32 4294967295, %s573_s6   ;;  %p549_p0 = scmp.ge.s32.totalorder %s573_s6, 1  ;;  %s573_s6 = sphi %s588_s6, %s11_s6  }
   0x2   : > { %p88_p1 = scmp.lt.s32.totalorder %s573_s6, 3 }
   0x4   : > { %p89_p2 = pnand %p549_p0, %p88_p1 }
   0x5   : > { %s550_s8 = sshll.u32 (!%p89_p2), %s545_s7, 3  ;;  %s575_s13 = smov (!%p89_p2), 16  }
   0x6   : > { %92 = sbr.rel (%p89_p2) target bundleno = 410 (0x19a), region = 24  ;;  %p109_p3 = scmp.lt.s32.totalorder (!%p89_p2), %s550_s8, 15 }
   0x7   : > { %s576_s14 = smov (!%p89_p2), 113   ;;  %s577_s15 = smov (!%p89_p2), 127  }
   0xb   : > { %s894_s8 = smov (!%p109_p3, %s550_s8), 15  ;;  %vm236_vm0 = vcmask 1047680   ;;  %v128_v41 = vlaneseq  ;;  %vm480_vm8 = vcmask 130048  }
   0xc   : > { %s551_s9 = sshll.u32 %s894_s8, 3 }
   0xd   : > { %s112_s12 = scalar_lea.vmem %s875_s0, %s551_s9  ;;  %v676_v42 = vshrl.u32 %v128_v41, 7  ;;  %v678_v45 = vand.u32 127, %v128_v41  ;;  %s792_s18 = scalar_lea.vmem %s876_s1, %s551_s9 }
   0xe   : > { %v604_v0 = vld [vmem:[%s112_s12] sm:$0xff]  ;;  %v606_v1 = vld [vmem:[%s112_s12 + $0x10] sm:$0xff]  ;;  %v612_v2 = vld [vmem:[%s112_s12 + $0x8] sm:$0xff] }
   0xf   : > { %237 = vrot.lane.b32.xlu0 %v604_v0, %s575_s13  ;;  %243 = vrot.lane.b32.xlu1 %v606_v1, %s575_s13  ;;  %v614_v3 = vld [vmem:[%s112_s12 + $0x18] sm:$0xff]  ;;  %v620_v4 = vld [vmem:[%s112_s12 + $0x20] sm:$0xff]  ;;  %v131_v48 = vadd.s32 16, %v676_v42  ;;  %v130_v49 = vadd.s32 8, %v676_v42  ;;  %vm235_vm1 = vcmp.eq.s32.totalorder %v678_v45, 0  ;;  %v358_v50 = vmul.f32 2.0, %v604_v0 }
  0x10   : > { %v622_v5 = vld [vmem:[%s112_s12 + $0x28] sm:$0xff]  ;;  %v628_v6 = vld [vmem:[%s112_s12 + $0x30] sm:$0xff]  ;;  %v630_v7 = vld [vmem:[%s112_s12 + $0x38] sm:$0xff]  ;;  %v359_v51 = vmul.f32 2.0, %v612_v2  ;;  %v360_v52 = vmul.f32 2.0, %v606_v1  ;;  %v133_v56 = vadd.s32 32, %v676_v42 }
  0x11   : > { %v155_v55 = vand.u32 15, %v131_v48  ;;  %v361_v57 = vmul.f32 2.0, %v614_v3  ;;  %v362_v58 = vmul.f32 2.0, %v620_v4  ;;  %vm325_vm2 = vcmp.eq.s32.totalorder %v678_v45, 15 }
  0x12   : > { %v148_v59 = vand.u32 15, %v130_v49  ;;  %v132_v61 = vadd.s32 24, %v676_v42  ;;  %v694_v62 = vadd.s32 40, %v676_v42  ;;  %v697_v63 = vadd.s32 48, %v676_v42 }
  0x13   : > { %240 = vrot.lane.b32.xlu0 %v612_v2, %s575_s13  ;;  %246 = vrot.lane.b32.xlu1 %v614_v3, %s575_s13  ;;  %vm398_vm3 = vcmp.lt.s32.totalorder %v676_v42, 1  ;;  %vm431_vm4 = vcmp.lt.s32.totalorder %v676_v42, 7  ;;  %vm704_vm5 = vcmp.eq.s32.totalorder %v155_v55, 0 }
  0x14   : > { %vm717_vm6 = vcmp.eq.s32.totalorder %v148_v59, 15 }
  0x17   : > { %249 = vrot.lane.b32.xlu0 %v620_v4, %s575_s13  ;;  %252 = vrot.lane.b32.xlu1 %v622_v5, %s575_s13 }
  0x1b   : > { %255 = vrot.lane.b32.xlu0 %v628_v6, %s575_s13  ;;  %258 = vrot.lane.b32.xlu1 %v630_v7, %s575_s13 }
  0x81   : > { %v238_v8 = vpop.permute.xlu0 %237  ;;  %v244_v9 = vpop.permute.xlu1 %243 }
  0x82   : > { %v239_v10 = vsel %vm236_vm0, %v238_v8, %v604_v0  ;;  %v245_v11 = vsel %vm236_vm0, %v244_v9, %v606_v1  ;;  %v169_v9 = vand.u32 15, %v133_v56 }
  0x83   : > { %261 = vrot.lane.b32.xlu0 %v239_v10, %s575_s13  ;;  %v709_v10 = vadd.s32 56, %v676_v42 }
  0x84   : > { %vm740_vm7 = vcmp.eq.s32.totalorder %v169_v9, 0 }
  0x85   : > { %v241_v12 = vpop.permute.xlu0 %240  ;;  %v247_v13 = vpop.permute.xlu1 %246 }
  0x86   : > { %v242_v14 = vsel %vm236_vm0, %v241_v12, %v612_v2  ;;  %v248_v15 = vsel %vm236_vm0, %v247_v13, %v614_v3 }
  0x87   : > { %265 = vrot.lane.b32.xlu0 %v245_v11, %s575_s13  ;;  %263 = vrot.lane.b32.xlu1 %v242_v14, %s575_s13  ;;  %v162_v14 = vand.u32 15, %v132_v61 }
  0x89   : > { %v250_v16 = vpop.permute.xlu0 %249  ;;  %v253_v17 = vpop.permute.xlu1 %252  ;;  %vm747_vm9 = vcmp.eq.s32.totalorder %v162_v14, 15 }
  0x8a   : > { %v251_v18 = vsel %vm236_vm0, %v250_v16, %v620_v4  ;;  %v254_v19 = vsel %vm236_vm0, %v253_v17, %v622_v5  ;;  %v183_v16 = vand.u32 15, %v697_v63 }
  0x8b   : > { %267 = vrot.lane.b32.xlu1 %v248_v15, %s575_s13  ;;  %269 = vrot.lane.b32.xlu0 %v251_v18, %s575_s13  ;;  %v176_v15 = vand.u32 15, %v694_v62 }
  0x8c   : > { %vm777_vm10 = vcmp.eq.s32.totalorder %v183_v16, 0 }
  0x8d   : > { %v256_v20 = vpop.permute.xlu0 %255  ;;  %v259_v21 = vpop.permute.xlu1 %258  ;;  %vm781_vm11 = vcmp.eq.s32.totalorder %v176_v15, 15 }
  0x8e   : > { %v257_v22 = vsel %vm236_vm0, %v256_v20, %v628_v6  ;;  %v260_v23 = vsel %vm236_vm0, %v259_v21, %v630_v7  ;;  %v141_v20 = vand.u32 15, %v676_v42 }
  0x8f   : > { %271 = vrot.lane.b32.xlu1 %v254_v19, %s575_s13  ;;  %273 = vrot.lane.b32.xlu0 %v257_v22, %s575_s13 }
  0x90   : > { %vm800_vm12 = vcmp.eq.s32.totalorder %v141_v20, 0 }
  0x93   : > { %275 = vrot.lane.b32.xlu1 %v260_v23, %s575_s13 }
  0xf5   : > { %v262_v24 = vpop.permute.xlu0 %261 }
  0xf6   : > { %v277_v25 = vsel %vm236_vm0, %v262_v24, %v604_v0  ;;  %v363_v0 = vmul.f32 2.0, %v622_v5 }
  0xf7   : > { %293 = vrot.lane.b32.xlu0 %v277_v25, %s576_s14 }
  0xf9   : > { %v264_v26 = vpop.permute.xlu1 %263  ;;  %v266_v27 = vpop.permute.xlu0 %265 }
  0xfa   : > { %v278_v28 = vsel %vm236_vm0, %v264_v26, %v612_v2  ;;  %v279_v29 = vsel %vm236_vm0, %v266_v27, %v606_v1  ;;  %v364_v1 = vmul.f32 2.0, %v628_v6  ;;  %v365_v2 = vmul.f32 2.0, %v630_v7 }
  0xfb   : > { %295 = vrot.lane.b32.xlu1 %v278_v28, %s576_s14  ;;  %297 = vrot.lane.b32.xlu0 %v279_v29, %s576_s14 }
  0xfd   : > { %v268_v30 = vpop.permute.xlu1 %267  ;;  %v270_v31 = vpop.permute.xlu0 %269 }
  0xfe   : > { %v280_v32 = vsel %vm236_vm0, %v268_v30, %v614_v3  ;;  %v281_v33 = vsel %vm236_vm0, %v270_v31, %v620_v4  ;;  %v190_v31 = vand.u32 15, %v709_v10 }
  0xff   : > { %299 = vrot.lane.b32.xlu1 %v280_v32, %s576_s14  ;;  %301 = vrot.lane.b32.xlu0 %v281_v33, %s576_s14 }
 0x100   : > { %vm804_vm13 = vcmp.eq.s32.totalorder %v190_v31, 15 }
 0x101   : > { %v272_v34 = vpop.permute.xlu1 %271  ;;  %v274_v35 = vpop.permute.xlu0 %273 }
 0x102   : > { %v282_v36 = vsel %vm236_vm0, %v272_v34, %v622_v5  ;;  %v283_v37 = vsel %vm236_vm0, %v274_v35, %v628_v6 }
 0x103   : > { %303 = vrot.lane.b32.xlu1 %v282_v36, %s576_s14  ;;  %305 = vrot.lane.b32.xlu0 %v283_v37, %s576_s14 }
 0x105   : > { %v276_v38 = vpop.permute.xlu1 %275 }
 0x106   : > { %v284_v39 = vsel %vm236_vm0, %v276_v38, %v630_v7 }
 0x107   : > { %307 = vrot.lane.b32.xlu1 %v284_v39, %s576_s14  ;;  %326 = vrot.lane.b32.xlu0 %v277_v25, %s577_s15 }
 0x10b   : > { %328 = vrot.lane.b32.xlu1 %v278_v28, %s577_s15  ;;  %330 = vrot.lane.b32.xlu0 %v279_v29, %s577_s15 }
 0x10f   : > { %332 = vrot.lane.b32.xlu1 %v280_v32, %s577_s15  ;;  %334 = vrot.lane.b32.xlu0 %v281_v33, %s577_s15 }
 0x113   : > { %336 = vrot.lane.b32.xlu1 %v282_v36, %s577_s15  ;;  %338 = vrot.lane.b32.xlu0 %v283_v37, %s577_s15 }
 0x117   : > { %340 = vrot.lane.b32.xlu1 %v284_v39, %s577_s15 }
 0x169   : > { %v294_v40 = vpop.permute.xlu0 %293 }
 0x16a   : > { %v317_v60 = vsel %vm235_vm1, 0.0, %v294_v40 }
 0x16b   : > { %v366_v11 = vadd.f32 %v358_v50, %v317_v60 }
 0x16d   : > { %v296_v43 = vpop.permute.xlu1 %295  ;;  %v298_v44 = vpop.permute.xlu0 %297 }
 0x16e   : > { %v318_v5 = vsel %vm235_vm1, 0.0, %v296_v43  ;;  %v319_v6 = vsel %vm235_vm1, 0.0, %v298_v44 }
 0x16f   : > { %v367_v21 = vadd.f32 %v359_v51, %v318_v5  ;;  %v368_v22 = vadd.f32 %v360_v52, %v319_v6 }
 0x171   : > { %v300_v46 = vpop.permute.xlu1 %299  ;;  %v302_v47 = vpop.permute.xlu0 %301 }
 0x172   : > { %v320_v13 = vsel %vm235_vm1, 0.0, %v300_v46  ;;  %v321_v17 = vsel %vm235_vm1, 0.0, %v302_v47 }
 0x173   : > { %v369_v27 = vadd.f32 %v361_v57, %v320_v13  ;;  %v370_v32 = vadd.f32 %v362_v58, %v321_v17 }
 0x175   : > { %v304_v53 = vpop.permute.xlu1 %303  ;;  %v306_v54 = vpop.permute.xlu0 %305 }
 0x176   : > { %v322_v18 = vsel %vm235_vm1, 0.0, %v304_v53  ;;  %v323_v23 = vsel %vm235_vm1, 0.0, %v306_v54 }
 0x177   : > { %v371_v33 = vadd.f32 %v363_v0, %v322_v18  ;;  %v372_v37 = vadd.f32 %v364_v1, %v323_v23 }
 0x179   : > { %v308_v3 = vpop.permute.xlu1 %307  ;;  %v327_v4 = vpop.permute.xlu0 %326 }
 0x17a   : > { %v350_v7 = vsel %vm325_vm2, 0.0, %v327_v4  ;;  %v324_v24 = vsel %vm235_vm1, 0.0, %v308_v3 }
 0x17b   : > { %v729_v19 = vadd.f32 %v366_v11, %v350_v7  ;;  %v751_v38 = vadd.f32 %v365_v2, %v324_v24 }
 0x17d   : > { %v329_v25 = vpop.permute.xlu1 %328  ;;  %v331_v26 = vpop.permute.xlu0 %330  ;;  %v390_v39 = vrot.slane %v729_v19, 7  ;;  %v423_v40 = vrot.slane %v729_v19, 1  ;;  %v759_v49 = vmul.f32 2.0, %v729_v19 }
 0x17e   : > { %v351_v28 = vsel %vm325_vm2, 0.0, %v329_v25  ;;  %v352_v29 = vsel %vm325_vm2, 0.0, %v331_v26 }
 0x17f   : > { %v745_v34 = vadd.f32 %v367_v21, %v351_v28  ;;  %v376_v35 = vadd.f32 %v368_v22, %v352_v29 }
 0x181   : > { %v391_v41 = vrot.slane %v745_v34, 7  ;;  %v424_v43 = vrot.slane %v745_v34, 1  ;;  %v449_v44 = vmul.f32 2.0, %v745_v34  ;;  %v392_v46 = vrot.slane %v376_v35, 7  ;;  %v333_v47 = vpop.permute.xlu1 %332  ;;  %v335_v48 = vpop.permute.xlu0 %334 }
 0x182   : > { %v425_v50 = vrot.slane %v376_v35, 1  ;;  %v353_v51 = vsel %vm325_vm2, 0.0, %v333_v47  ;;  %v354_v52 = vsel %vm325_vm2, 0.0, %v335_v48  ;;  %v450_v55 = vmul.f32 2.0, %v376_v35 }
 0x183   : > { %v405_v53 = vsel %vm398_vm3, %v390_v39, %v391_v41  ;;  %v404_v54 = vsel %vm398_vm3, %v391_v41, %v392_v46  ;;  %v377_v56 = vadd.f32 %v369_v27, %v353_v51  ;;  %v378_v60 = vadd.f32 %v370_v32, %v354_v52 }
 0x184   : > { %v457_v57 = vadd.f32 %v449_v44, %v405_v53  ;;  %v409_v58 = vsel %vm704_vm5, 0.0, %v404_v54  ;;  %v437_v59 = vsel %vm431_vm4, %v424_v43, %v425_v50 }
 0x185   : > { %v441_v63 = vsel %vm717_vm6, 0.0, %v437_v59  ;;  %v458_v0 = vadd.f32 %v450_v55, %v409_v58  ;;  %v393_v1 = vrot.slane %v377_v56, 7  ;;  %v426_v2 = vrot.slane %v377_v56, 1  ;;  %v337_v3 = vpop.permute.xlu1 %336  ;;  %v339_v11 = vpop.permute.xlu0 %338 }
 0x186   : > { %v465_v4 = vadd.f32 %v457_v57, %v441_v63  ;;  %v451_v8 = vmul.f32 2.0, %v377_v56  ;;  %v394_v9 = vrot.slane %v378_v60, 7  ;;  %v427_v10 = vrot.slane %v378_v60, 1 }
 0x187   : > { %v403_v5 = vsel %vm398_vm3, %v392_v46, %v393_v1  ;;  %v436_v6 = vsel %vm431_vm4, %v425_v50, %v426_v2  ;;  %v452_v7 = vmul.f32 2.0, %v378_v60  ;;  %v355_v12 = vsel %vm325_vm2, 0.0, %v337_v3 }
 0x188   : > { %v473_v15 = vmul.f32 0.0625, %v465_v4  ;;  %v459_v16 = vadd.f32 %v451_v8, %v403_v5  ;;  %v466_v17 = vadd.f32 %v458_v0, %v436_v6  ;;  %v402_v18 = vsel %vm398_vm3, %v393_v1, %v394_v9 }
 0x189   : > { %v411_v21 = vsel %vm740_vm7, 0.0, %v402_v18  ;;  %v435_v20 = vsel %vm431_vm4, %v426_v2, %v427_v10  ;;  %v379_v22 = vadd.f32 %v371_v33, %v355_v12  ;;  %v356_v23 = vsel %vm325_vm2, 0.0, %v339_v11  ;;  %v341_v24 = vpop.permute.xlu1 %340 }
 0x18a   : > { %482 = vst.msk [vmem:[%s792_s18 + $0x8] sm:$0xff] %vm480_vm8, %v473_v15  ;;  %v474_v25 = vmul.f32 0.0625, %v466_v17  ;;  %v443_v26 = vsel %vm747_vm9, 0.0, %v435_v20  ;;  %v460_v27 = vadd.f32 %v452_v7, %v411_v21  ;;  %v380_v28 = vadd.f32 %v372_v37, %v356_v23 }
 0x18b   : > { %v467_v29 = vadd.f32 %v459_v16, %v443_v26  ;;  %v395_v31 = vrot.slane %v379_v22, 7  ;;  %v428_v30 = vrot.slane %v379_v22, 1  ;;  %v453_v32 = vmul.f32 2.0, %v379_v22 }
 0x18c   : > { %483 = vst.msk [vmem:[%s792_s18 + $0x10] sm:$0xff] %vm480_vm8, %v474_v25  ;;  %v396_v33 = vrot.slane %v380_v28, 7  ;;  %v429_v35 = vrot.slane %v380_v28, 1  ;;  %v454_v41 = vmul.f32 2.0, %v380_v28  ;;  %v357_v44 = vsel %vm325_vm2, 0.0, %v341_v24 }
 0x18d   : > { %v475_v46 = vmul.f32 0.0625, %v467_v29  ;;  %v401_v36 = vsel %vm398_vm3, %v394_v9, %v395_v31  ;;  %v434_v37 = vsel %vm431_vm4, %v427_v10, %v428_v30  ;;  %v381_v47 = vadd.f32 %v751_v38, %v357_v44 }
 0x18e   : > { %v461_v48 = vadd.f32 %v453_v32, %v401_v36  ;;  %v468_v50 = vadd.f32 %v460_v27, %v434_v37  ;;  %v400_v51 = vsel %vm398_vm3, %v395_v31, %v396_v33  ;;  %v433_v52 = vsel %vm431_vm4, %v428_v30, %v429_v35 }
 0x18f   : > { %484 = vst.msk [vmem:[%s792_s18 + $0x18] sm:$0xff] %vm480_vm8, %v475_v46  ;;  %v413_v45 = vsel %vm777_vm10, 0.0, %v400_v51  ;;  %v445_v53 = vsel %vm781_vm11, 0.0, %v433_v52  ;;  %v397_v54 = vrot.slane %v381_v47, 7  ;;  %v430_v55 = vrot.slane %v381_v47, 1 }
 0x190   : > { %v476_v38 = vmul.f32 0.0625, %v468_v50  ;;  %v462_v56 = vadd.f32 %v454_v41, %v413_v45  ;;  %v469_v57 = vadd.f32 %v461_v48, %v445_v53  ;;  %v455_v58 = vmul.f32 2.0, %v381_v47 }
 0x191   : > { %v399_v59 = vsel %vm398_vm3, %v396_v33, %v397_v54  ;;  %v406_v60 = vsel %vm398_vm3, %v397_v54, %v390_v39  ;;  %v432_v61 = vsel %vm431_vm4, %v429_v35, %v430_v55  ;;  %v439_v62 = vsel %vm431_vm4, %v430_v55, %v423_v40 }
 0x192   : > { %485 = vst.msk [vmem:[%s792_s18 + $0x20] sm:$0xff] %vm480_vm8, %v476_v38  ;;  %v477_v63 = vmul.f32 0.0625, %v469_v57  ;;  %v407_v0 = vsel %vm800_vm12, 0.0, %v406_v60  ;;  %v447_v39 = vsel %vm804_vm13, 0.0, %v439_v62  ;;  %v463_v1 = vadd.f32 %v455_v58, %v399_v59 }
 0x193   : > { %v456_v2 = vadd.f32 %v759_v49, %v407_v0  ;;  %v470_v3 = vadd.f32 %v462_v56, %v432_v61  ;;  %v438_v4 = vsel %vm431_vm4, %v423_v40, %v424_v43 }
 0x194   : > { %486 = vst.msk [vmem:[%s792_s18 + $0x28] sm:$0xff] %vm480_vm8, %v477_v63  ;;  %v471_v8 = vadd.f32 %v463_v1, %v447_v39 }
 0x195   : > { %v464_v9 = vadd.f32 %v456_v2, %v438_v4  ;;  %v478_v10 = vmul.f32 0.0625, %v470_v3 }
 0x196   : > { %v479_v11 = vmul.f32 0.0625, %v471_v8 }
 0x197   : > { %v472_v5 = vmul.f32 0.0625, %v464_v9  ;;  %487 = vst.msk [vmem:[%s792_s18 + $0x30] sm:$0xff] %vm480_vm8, %v478_v10 }
 0x198   : > { %488 = vst.msk [vmem:[%s792_s18 + $0x38] sm:$0xff] %vm480_vm8, %v479_v11 }
 0x199   : > { %481 = vst.msk [vmem:[%s792_s18] sm:$0xff] %vm480_vm8, %v472_v5 }
 0x19a PF: > { %s11_s6 = sadd.s32 1, %s573_s6  }
 0x19b   : > { %p8_p4 = scmp.ge.s32.totalorder %s11_s6, 4  }
 0x19d   :  { %10 = sbr.rel (!%p8_p4) target bundleno = 1 (0x1), region = 54 }

</bundles_post_ra>
